<compile_context>
chip_gen: v7x
topology: tpu7x:2x2x1
jax: 0.10.0
libtpu: 0.0.40
codegen_flags: <defaults>
</compile_context>

<pallas_src>
import math

import jax
import jax.numpy as jnp
from jax.experimental import pallas as pl
from jax.experimental.pallas import tpu as pltpu

_MIB = 1 << 20
_VMEM_WORKING_SET_BUDGET = 36 * _MIB   # keeps well under v7x's 64 MiB physical
_TM_TARGET = 512                       # ~HBM/MXU ridge for v6e; fine on v5e/v7x
_GELU_C = math.sqrt(2.0 / math.pi)


def _gelu_tanh(h):
    # nn.GELU(approximate='tanh'); tanh goes to the EUP slot.
    return 0.5 * h * (1.0 + jnp.tanh(_GELU_C * (h + 0.044715 * h * h * h)))


# ------------------------------ Pallas kernels -------------------------------

def _mlp_kernel_resident(x_ref, w1_ref, b1_ref, w2_ref, b2_ref, o_ref):
    """Weights fully resident in VMEM; one row tile per grid step."""
    h = jnp.dot(x_ref[...], w1_ref[...], preferred_element_type=jnp.float32)
    h = _gelu_tanh(h + b1_ref[...])
    y = jnp.dot(h.astype(w2_ref.dtype), w2_ref[...],
                preferred_element_type=jnp.float32)
    o_ref[...] = (y + b2_ref[...]).astype(o_ref.dtype)


def _mlp_kernel_htiled(x_ref, w1_ref, b1_ref, w2_ref, b2_ref, o_ref, acc_ref):
    """Rows tile i (parallel) x hidden tile h (reduction) with f32 accumulator."""
    h_idx = pl.program_id(1)

    @pl.when(h_idx == 0)
    def _():
        acc_ref[...] = jnp.zeros_like(acc_ref)

    h = jnp.dot(x_ref[...], w1_ref[...], preferred_element_type=jnp.float32)
    h = _gelu_tanh(h + b1_ref[...])
    acc_ref[...] += jnp.dot(h.astype(w2_ref.dtype), w2_ref[...],
                            preferred_element_type=jnp.float32)

    @pl.when(h_idx == pl.num_programs(1) - 1)
    def _():
        o_ref[...] = (acc_ref[...] + b2_ref[...]).astype(o_ref.dtype)


# --------------------------- tiling / VMEM budgeting --------------------------

def _round_up(n, m):
    return ((n + m - 1) // m) * m


def _resident_vmem_bytes(tm, C, Hn, out_bytes):
    x_t = 2 * tm * C * 2                 # bf16 x tile, double-buffered
    w = 2 * (C * Hn + Hn * C) * 2        # both weights (conservative 2x buffers)
    b = 2 * (Hn + C) * 4
    hid = tm * Hn * (4 + 2)              # f32 hidden + bf16 cast (transient)
    o_t = 2 * tm * C * out_bytes
    return x_t + w + b + hid + o_t


def _htiled_vmem_bytes(tm, th, C, Hn, out_bytes):
    del Hn
    x_t = 2 * tm * C * 2
    w = 2 * (C * th + th * C) * 2        # streamed weight slices, double-buffered
    b = 2 * (th + C) * 4
    acc = tm * C * 4
    hid = tm * th * (4 + 2)
    o_t = 2 * tm * C * out_bytes
    return x_t + w + b + acc + hid + o_t


def _choose_plan(M, C, Hn, out_bytes, tm_target=_TM_TARGET,
                 budget=_VMEM_WORKING_SET_BUDGET):
    # Keep >= 2 row tiles when M is large enough so the v7x megacore has work.
    if M >= 256:
        tm_target = min(tm_target, max(128, _round_up((M + 1) // 2, 8)))
    tm_full = _round_up(max(M, 1), 8)

    tm_cands = []
    for t in (tm_target, 384, 256, 128, 64, 32, 16, 8):
        t = min(t, tm_full)
        if t not in tm_cands:
            tm_cands.append(t)

    # Prefer weight-resident: weights are DMA'd once, only x/out stream.
    for tm in tm_cands:
        if _resident_vmem_bytes(tm, C, Hn, out_bytes) <= budget:
            return "resident", tm, Hn
        if tm <= 128:   # don't shrink rows further just to keep weights resident
            break

    th_cands = [t for t in (512, 384, 256, 128) if t <= Hn and Hn % t == 0]
    if not th_cands:
        th_cands = [Hn]
    for tm in tm_cands:
        for th in th_cands:
            if _htiled_vmem_bytes(tm, th, C, Hn, out_bytes) <= budget:
                return "htiled", tm, th
    # TODO(synk): for C >= 8192 add a third grid axis tiling the C dimension.
    return "htiled", tm_cands[-1], th_cands[-1]


# ------------------------------ Pallas wrapper -------------------------------

def pallas_mlp(x, w_fc, b_fc, w_proj, b_proj, *, out_dtype=jnp.bfloat16):
    """y = GELU_tanh(x @ w_fc + b_fc) @ w_proj + b_proj.

    x: (M, C); w_fc: (C, 4C); b_fc: (4C,); w_proj: (4C, C); b_proj: (C,)
    """
    M, C = x.shape
    Hn = w_fc.shape[1]
    assert w_fc.shape == (C, Hn) and w_proj.shape == (Hn, C)

    out_bytes = jnp.dtype(out_dtype).itemsize
    plan, tm, th = _choose_plan(M, C, Hn, out_bytes)

    # bf16 operands at the boundary (weights already stored bf16 -> no-op cast),
    # f32 MXU accumulation inside the kernel.
    x_b = x.astype(jnp.bfloat16)
    w1_b = w_fc.astype(jnp.bfloat16)
    w2_b = w_proj.astype(jnp.bfloat16)
    b1_2d = b_fc.reshape(1, Hn).astype(jnp.float32)
    b2_2d = b_proj.reshape(1, C).astype(jnp.float32)

    # Pad rows to a tile multiple instead of falling back to awkward tiles.
    M_pad = _round_up(M, tm)
    if M_pad != M:
        x_b = jnp.pad(x_b, ((0, M_pad - M), (0, 0)))

    if plan == "resident":
        grid = (M_pad // tm,)
        in_specs = [
            pl.BlockSpec((tm, C), lambda i: (i, 0)),    # x rows tile (streamed)
            pl.BlockSpec((C, Hn), lambda i: (0, 0)),    # w_fc   (resident)
            pl.BlockSpec((1, Hn), lambda i: (0, 0)),    # b_fc   (resident)
            pl.BlockSpec((Hn, C), lambda i: (0, 0)),    # w_proj (resident)
            pl.BlockSpec((1, C), lambda i: (0, 0)),     # b_proj (resident)
        ]
        out_specs = pl.BlockSpec((tm, C), lambda i: (i, 0))
        scratch_shapes = []
        dims = ("parallel",)
        kernel = _mlp_kernel_resident
        est = _resident_vmem_bytes(tm, C, Hn, out_bytes)
    else:
        grid = (M_pad // tm, Hn // th)
        in_specs = [
            pl.BlockSpec((tm, C), lambda i, h: (i, 0)),   # x rows tile
            pl.BlockSpec((C, th), lambda i, h: (0, h)),   # w_fc hidden slice
            pl.BlockSpec((1, th), lambda i, h: (0, h)),   # b_fc hidden slice
            pl.BlockSpec((th, C), lambda i, h: (h, 0)),   # w_proj hidden slice
            pl.BlockSpec((1, C), lambda i, h: (0, 0)),    # b_proj (resident)
        ]
        out_specs = pl.BlockSpec((tm, C), lambda i, h: (i, 0))
        scratch_shapes = [pltpu.VMEM((tm, C), jnp.float32)]
        dims = ("parallel", "arbitrary")
        kernel = _mlp_kernel_htiled
        est = _htiled_vmem_bytes(tm, th, C, Hn, out_bytes)

    # Explicit scoped-VMEM limit derived from the actual tile working set
    # (defaults are 16 MiB on v5e / 32 MiB on v6e+v7x and would reject the
    # larger tiles at real GPT shapes).
    vmem_limit = int(min(max(est * 5 // 4 + 4 * _MIB, 32 * _MIB), 56 * _MIB))

    y = pl.pallas_call(
        kernel,
        out_shape=jax.ShapeDtypeStruct((M_pad, C), out_dtype),
        grid=grid,
        in_specs=in_specs,
        out_specs=out_specs,
        scratch_shapes=scratch_shapes,
        compiler_params=pltpu.CompilerParams(
            dimension_semantics=dims,
            vmem_limit_bytes=vmem_limit),
    )(x_b, w1_b, b1_2d, w2_b, b2_2d)

    if M_pad != M:
        y = y[:M]
    return y


@jax.jit
def mlp_forward(x, params):
    """x: (..., C) -> (..., C), mirroring MLP.forward (bf16 activations out)."""
    orig_shape = x.shape
    C = orig_shape[-1]
    x2d = x.reshape(-1, C)
    y2d = pallas_mlp(x2d, params["w_fc"], params["b_fc"],
                     params["w_proj"], params["b_proj"])
    return y2d.reshape(orig_shape)


def init_params(key, embed_size, num_blocks=2):
    std = 0.02
    proj_std = 0.02 / math.sqrt(2 * num_blocks)   # GPT-style c_proj scaling
    k1, k2 = jax.random.split(key)
    C, Hn = embed_size, 4 * embed_size
    return {
        # stored as (in, out): y = x @ W + b  (== PyTorch x @ W.T, W (out,in)).
        # Weights kept in bf16 so the kernel wrapper never re-casts them.
        "w_fc": (std * jax.random.normal(k1, (C, Hn))).astype(jnp.bfloat16),
        "b_fc": jnp.zeros((Hn,), jnp.float32),
        "w_proj": (proj_std * jax.random.normal(k2, (Hn, C))).astype(jnp.bfloat16),
        "b_proj": jnp.zeros((C,), jnp.float32),
    }
    # TODO(synk): config.bias=False variant would simply drop b_fc/b_proj.


def _reference_mlp(x, params):
    h = x @ params["w_fc"].astype(jnp.float32) + params["b_fc"]
    h = _gelu_tanh(h)
    return h @ params["w_proj"].astype(jnp.float32) + params["b_proj"]


# ----------------------------------- main ------------------------------------

if __name__ == "__main__":
    B, T, EMBED = 2, 8, 32     # small shapes consistent with the module

    key = jax.random.PRNGKey(0)
    pkey, xkey = jax.random.split(key)
    params = init_params(pkey, EMBED)
    x = jax.random.normal(xkey, (B, T, EMBED), dtype=jnp.float32)

    y = mlp_forward(x, params)
    jax.block_until_ready(y)

    assert y.shape == (B, T, EMBED)
    assert bool(jnp.all(jnp.isfinite(y)))

    # Sanity check vs pure-JAX reference (bf16 matmuls/output -> loose tol).
    y_ref = _reference_mlp(x.reshape(-1, EMBED), params).reshape(B, T, EMBED)
    max_err = float(jnp.max(jnp.abs(y.astype(jnp.float32) - y_ref)))
    assert max_err < 2e-2, f"max abs err {max_err}"

    print("KERNEL_OK")
</pallas_src>

<mosaic_0001>
module attributes {stable_mosaic.version = 11 : i64} {
  func.func @_mlp_kernel_resident(%arg0: i32, %arg1: memref<16x32xbf16, #tpu.memory_space<vmem>>, %arg2: memref<32x128xbf16, #tpu.memory_space<vmem>>, %arg3: memref<1x128xf32, #tpu.memory_space<vmem>>, %arg4: memref<128x32xbf16, #tpu.memory_space<vmem>>, %arg5: memref<1x32xf32, #tpu.memory_space<vmem>>, %arg6: memref<16x32xbf16, #tpu.memory_space<vmem>>) attributes {dimension_semantics = [#tpu.dimension_semantics<parallel>], iteration_bounds = array<i64: 1>, scalar_prefetch = 0 : i64, scratch_operands = 0 : i64, tpu.core_type = #tpu.core_type<tc>, window_params = [{transform_indices = @transform_0, window_bounds = array<i64: 16, 32>}, {pipeline_mode = #tpu.pipeline_mode<synchronous>, transform_indices = @transform_1, window_bounds = array<i64: 32, 128>}, {pipeline_mode = #tpu.pipeline_mode<synchronous>, transform_indices = @transform_2, window_bounds = array<i64: 1, 128>}, {pipeline_mode = #tpu.pipeline_mode<synchronous>, transform_indices = @transform_3, window_bounds = array<i64: 128, 32>}, {pipeline_mode = #tpu.pipeline_mode<synchronous>, transform_indices = @transform_4, window_bounds = array<i64: 1, 32>}, {transform_indices = @transform_5, window_bounds = array<i64: 16, 32>}]} {
    %c0 = arith.constant 0 : index
    %c0_0 = arith.constant 0 : index
    %0 = vector.load %arg1[%c0, %c0_0] : memref<16x32xbf16, #tpu.memory_space<vmem>>, vector<16x32xbf16>
    %c0_1 = arith.constant 0 : index
    %c0_2 = arith.constant 0 : index
    %1 = vector.load %arg2[%c0_1, %c0_2] : memref<32x128xbf16, #tpu.memory_space<vmem>>, vector<32x128xbf16>
    %cst = arith.constant dense<0.000000e+00> : vector<16x128xf32>
    %2 = tpu.matmul %0, %1, %cst {dimension_numbers = #tpu.dot_dimension_numbers<[1], [0], [0], [1], [0, 0, 1, 1], [], []>} : vector<16x32xbf16>, vector<32x128xbf16>, vector<16x128xf32> -> vector<16x128xf32>
    %c0_3 = arith.constant 0 : index
    %c0_4 = arith.constant 0 : index
    %3 = vector.load %arg3[%c0_3, %c0_4] : memref<1x128xf32, #tpu.memory_space<vmem>>, vector<1x128xf32>
    %4 = vector.broadcast %3 : vector<1x128xf32> to vector<16x128xf32>
    %5 = arith.addf %2, %4 : vector<16x128xf32>
    %cst_5 = arith.constant 5.000000e-01 : f32
    %6 = vector.broadcast %cst_5 : f32 to vector<16x128xf32>
    %7 = arith.mulf %6, %5 : vector<16x128xf32>
    %cst_6 = arith.constant 4.471500e-02 : f32
    %8 = vector.broadcast %cst_6 : f32 to vector<16x128xf32>
    %9 = arith.mulf %8, %5 : vector<16x128xf32>
    %10 = arith.mulf %9, %5 : vector<16x128xf32>
    %11 = arith.mulf %10, %5 : vector<16x128xf32>
    %12 = arith.addf %5, %11 : vector<16x128xf32>
    %cst_7 = arith.constant 0.797884583 : f32
    %13 = vector.broadcast %cst_7 : f32 to vector<16x128xf32>
    %14 = arith.mulf %13, %12 : vector<16x128xf32>
    %15 = math.tanh %14 : vector<16x128xf32>
    %cst_8 = arith.constant 1.000000e+00 : f32
    %16 = vector.broadcast %cst_8 : f32 to vector<16x128xf32>
    %17 = arith.addf %16, %15 : vector<16x128xf32>
    %18 = arith.mulf %7, %17 : vector<16x128xf32>
    %19 = arith.truncf %18 : vector<16x128xf32> to vector<16x128xbf16>
    %c0_9 = arith.constant 0 : index
    %c0_10 = arith.constant 0 : index
    %20 = vector.load %arg4[%c0_9, %c0_10] : memref<128x32xbf16, #tpu.memory_space<vmem>>, vector<128x32xbf16>
    %cst_11 = arith.constant dense<0.000000e+00> : vector<16x32xf32>
    %21 = tpu.matmul %19, %20, %cst_11 {dimension_numbers = #tpu.dot_dimension_numbers<[1], [0], [0], [1], [0, 0, 1, 1], [], []>} : vector<16x128xbf16>, vector<128x32xbf16>, vector<16x32xf32> -> vector<16x32xf32>
    %c0_12 = arith.constant 0 : index
    %c0_13 = arith.constant 0 : index
    %22 = vector.load %arg5[%c0_12, %c0_13] : memref<1x32xf32, #tpu.memory_space<vmem>>, vector<1x32xf32>
    %23 = vector.broadcast %22 : vector<1x32xf32> to vector<16x32xf32>
    %24 = arith.addf %21, %23 : vector<16x32xf32>
    %25 = arith.truncf %24 : vector<16x32xf32> to vector<16x32xbf16>
    %c0_14 = arith.constant 0 : index
    %c0_15 = arith.constant 0 : index
    %26 = vector.load %arg6[%c0_14, %c0_15] : memref<16x32xbf16, #tpu.memory_space<vmem>>, vector<16x32xbf16>
    tpu.vector_store %arg6[%c0_14, %c0_15], %25 {strides = array<i32>} : memref<16x32xbf16, #tpu.memory_space<vmem>>, vector<16x32xbf16>,
    return
  }
  func.func @transform_0(%arg0: i32) -> (i32, i32) {
    %c0_i32 = arith.constant 0 : i32
    %c0_i32_0 = arith.constant 0 : i32
    return %arg0, %c0_i32 : i32, i32
  }
  func.func @transform_1(%arg0: i32) -> (i32, i32) {
    %c0_i32 = arith.constant 0 : i32
    %c0_i32_0 = arith.constant 0 : i32
    %c0_i32_1 = arith.constant 0 : i32
    return %c0_i32, %c0_i32_0 : i32, i32
  }
  func.func @transform_2(%arg0: i32) -> (i32, i32) {
    %c0_i32 = arith.constant 0 : i32
    %c0_i32_0 = arith.constant 0 : i32
    %c0_i32_1 = arith.constant 0 : i32
    return %c0_i32, %c0_i32_0 : i32, i32
  }
  func.func @transform_3(%arg0: i32) -> (i32, i32) {
    %c0_i32 = arith.constant 0 : i32
    %c0_i32_0 = arith.constant 0 : i32
    %c0_i32_1 = arith.constant 0 : i32
    return %c0_i32, %c0_i32_0 : i32, i32
  }
  func.func @transform_4(%arg0: i32) -> (i32, i32) {
    %c0_i32 = arith.constant 0 : i32
    %c0_i32_0 = arith.constant 0 : i32
    %c0_i32_1 = arith.constant 0 : i32
    return %c0_i32, %c0_i32_0 : i32, i32
  }
  func.func @transform_5(%arg0: i32) -> (i32, i32) {
    %c0_i32 = arith.constant 0 : i32
    %c0_i32_0 = arith.constant 0 : i32
    return %arg0, %c0_i32 : i32, i32
  }
}

</mosaic_0001>

<bundles_post_ra>
// kernel: mlp_forward.1
= control target key start
LH: loop header
LB: loop body
LE: loop exit
PB: predicated region body
PF: predicated region fallthrough
CT: control target
= control target key end

     0   :  { %v357_v1 = vmov 0.0   ;;  %vm358_vm0 = vmmov 0   ;;  %vm52_vm1 = vcmask 261120   ;;  %s443_s0 = inlined_call_operand.vmem [shape: bf16[16,32], index: 0, kind: input, shape index: {}]   ;;  %s444_s1 = inlined_call_operand.vmem [shape: bf16[32,128], index: 1, kind: input, shape index: {}]   ;;  %s445_s2 = inlined_call_operand.vmem [shape: f32[1,128], index: 2, kind: input, shape index: {}]   ;;  %s446_s3 = inlined_call_operand.vmem [shape: bf16[128,32], index: 3, kind: input, shape index: {}]   ;;  %s447_s4 = inlined_call_operand.vmem [shape: f32[1,32], index: 4, kind: input, shape index: {}]   ;;  %s448_s5 = inlined_call_operand.hbm [shape: bf16[16,32], index: 5, kind: output, shape index: {}]  }
   0x1   :  { %v318_v0 = vld [vmem:[%s444_s1] sm:$0xff]   ;;  %285 = vmatprep.subr.bf16.mxu0 %v357_v1  ;;  %293 = vmatprep.subr.bf16.mxu1 %v357_v1  ;;  %v319_v2 = vld [vmem:[%s444_s1 + $0x8] sm:$0xff]  }
   0x2   :  { %286 = vmatpush3.bf16.msra.mxu0 %v318_v0  ;;  %289 = vmatprep.mubr.msk.bf16.mxu0 %vm358_vm0, %v357_v1  ;;  %v320_v3 = vld [vmem:[%s443_s0] sm:$0xff]  }
   0x3   :  { %287 = vmatprep.subr.bf16.mxu0 %v357_v1  ;;  %309 = vmatprep.mubr.msk.bf16.mxu1 %vm358_vm0, %v357_v1 }
   0x6   :  { %288 = vmatpush3.bf16.msra.mxu0 %v319_v2 }
   0x7   :  { %10 = vsyncpa [#allocation3], 0  ;;  %v321_v4 = vld [vmem:[%s446_s3] sm:$0xff]   ;;  %v322_v5 = vld [vmem:[%s446_s3 + $0x8] sm:$0xff]   ;;  %s359_s15 = smov [#allocation2]   ;;  %vm236_vm2 = vcmask 257024  }
   0x8   :  { %294 = vmatpush3.bf16.msra.mxu1 %v321_v4  ;;  %v323_v6 = vld [vmem:[%s446_s3 + $0x10] sm:$0xff]   ;;  %v324_v7 = vld [vmem:[%s446_s3 + $0x18] sm:$0xff]   ;;  %v325_v8 = vld [vmem:[%s446_s3 + $0x20] sm:$0xff]   ;;  %s244_s16 = sshll.u32 %s359_s15, 4  ;;  %s245_s16 = int_to_ptr.vmem [resolvable:$true] %s244_s16 }
   0x9   :  { %290 = vmatmul.mubr.msk.bf16.vlgmr.msra.gmra.mrb[0].mxu0 %vm52_vm1, %v320_v3  ;;  %295 = vmatprep.subr.bf16.mxu1 %v357_v1  ;;  %v326_v9 = vld [vmem:[%s446_s3 + $0x28] sm:$0xff]   ;;  %v327_v10 = vld [vmem:[%s446_s3 + $0x30] sm:$0xff]   ;;  %v328_v11 = vld [vmem:[%s446_s3 + $0x38] sm:$0xff]   ;;  %s333_s17 = scalar_lea.vmem %s245_s16, 128  ;;  %p338_p1 = scmp.lt.s32.totalorder %s245_s16, %s245_s16 }
   0xa   :  { %v255_v12 = vld [vmem:[%s445_s2] ss:$0 sm:$0xff]  ;;  %p334_p0 = scmp.ne.s32.totalorder %s245_s16, %s333_s17  ;;  %p339_p2 = scmp.lt.s32.totalorder %s333_s17, %s333_s17 }
   0xb   :  { %v260_v38 = vld [vmem:[%s447_s4] ss:$0 sm:$0xff] }
   0xc   :  { %296 = vmatpush3.bf16.msra.mxu1 %v322_v5  ;;  %p340_p3 = por %p339_p2, %p338_p1 }
   0xd   :  { %297 = vmatprep.subr.bf16.mxu1 %v357_v1 }
   0xe   :  { %p341_p4 = pnand %p340_p3, %p334_p0 }
  0x10   :  { %298 = vmatpush3.bf16.msra.mxu1 %v323_v6 }
  0x11   :  { %299 = vmatprep.subr.bf16.mxu1 %v357_v1 }
  0x14   :  { %300 = vmatpush3.bf16.msra.mxu1 %v324_v7 }
  0x15   :  { %301 = vmatprep.subr.bf16.mxu1 %v357_v1 }
  0x18   :  { %302 = vmatpush3.bf16.msra.mxu1 %v325_v8 }
  0x19   :  { %303 = vmatprep.subr.bf16.mxu1 %v357_v1 }
  0x1c   :  { %304 = vmatpush3.bf16.msra.mxu1 %v326_v9 }
  0x1d   :  { %305 = vmatprep.subr.bf16.mxu1 %v357_v1 }
  0x20   :  { %306 = vmatpush3.bf16.msra.mxu1 %v327_v10 }
  0x21   :  { %307 = vmatprep.subr.bf16.mxu1 %v357_v1 }
  0x24   :  { %308 = vmatpush3.bf16.msra.mxu1 %v328_v11 }
  0xdc   :  { %v90_v13 = vpop.f32.mrb[0].mxu0 }
  0xdd   :  { %v91_v14 = vadd.f32 %v255_v12, %v90_v13  ;;  %v291_v15 = vpop.f32.mrb[1].mxu0 }
  0xde   :  { %v93_v16 = vpop.f32.mrb[2].mxu0 }
  0xdf   :  { %v99_v17 = vmul.f32 0.044715, %v91_v14  ;;  %v94_v18 = vadd.f32 %v255_v12, %v93_v16  ;;  %v292_v19 = vpop.f32.mrb[3].mxu0  ;;  %v97_v32 = vmul.f32 0.5, %v91_v14 }
  0xe1   :  { %v101_v20 = vmul.f32 %v99_v17, %v91_v14  ;;  %v100_v21 = vmul.f32 0.044715, %v94_v18  ;;  %v98_v33 = vmul.f32 0.5, %v94_v18 }
  0xe3   :  { %v103_v22 = vmul.f32 %v101_v20, %v91_v14  ;;  %v102_v23 = vmul.f32 %v100_v21, %v94_v18 }
  0xe5   :  { %v104_v24 = vmul.f32 %v102_v23, %v94_v18  ;;  %v105_v25 = vadd.f32 %v103_v22, %v91_v14 }
  0xe7   :  { %v106_v26 = vadd.f32 %v104_v24, %v94_v18  ;;  %v107_v27 = vmul.f32 0.7978846, %v105_v25 }
  0xe9   :  { %v108_v28 = vmul.f32 0.7978846, %v106_v26  ;;  %329 = vtanh.f32 %v107_v27 }
  0xeb   :  { %331 = vtanh.f32 %v108_v28 }
  0xf3   :  { %v330_v29 = vpop.eup %329 }
  0xf4   :  { %v111_v30 = vadd.f32 1.0, %v330_v29 }
  0xf5   :  { %v332_v31 = vpop.eup %331 }
  0xf6   :  { %v112_v34 = vadd.f32 1.0, %v332_v31  ;;  %v113_v35 = vmul.f32 %v111_v30, %v97_v32 }
  0xf8   :  { %v114_v36 = vmul.f32 %v112_v34, %v98_v33 }
  0xfa   :  { %v115_v37 = vpack.c.bf16 %v114_v36, %v113_v35 }
  0xfc   :  { %310 = vmatmul.mubr.bf16.vlgmr.msra.gmra.mrb[0].mxu1 %v115_v37 }
 0x1cf   :  { %v221_v39 = vpop.f32.mrb[0].mxu1 }
 0x1d0   :  { %v222_v40 = vadd.f32 %v260_v38, %v221_v39  ;;  %v311_v41 = vpop.f32.mrb[1].mxu1 }
 0x1d1   :  { %v224_v42 = vpop.f32.mrb[2].mxu1 }
 0x1d2   :  { %v271_v43 = vpack.c.bf16 %v222_v40, %v222_v40  ;;  %v225_v44 = vadd.f32 %v260_v38, %v224_v42  ;;  %v312_v45 = vpop.f32.mrb[3].mxu1 }
 0x1d4   :  { %237 = vst.msk [vmem:[#allocation2] sm:$0xf] %vm236_vm2, %v271_v43  ;;  %v272_v46 = vpack.c.bf16 %v225_v44, %v225_v44 }
 0x1d6   :  { %238 = vst.msk [vmem:[#allocation2 + $0x4] sm:$0xf] %vm236_vm2, %v272_v46 }
 0x1d7   :  { %344 = shalt.err (!%p341_p4)
}
 0x1d8   :  { %s345_s19 = scalar_lea.hbm %s448_s5, 128 }
 0x1d9   :  { %p346_p5 = scmp.ne.s32.totalorder %s448_s5, %s345_s19  ;;  %p349_p6 = scmp.lt.u32.totalorder %s345_s19, %s448_s5 }
 0x1db   :  { %p351_p7 = pnand %p349_p6, %p346_p5 }
 0x1dd   :  { %354 = shalt.err (!%p351_p7)
}
 0x1de   :  { %s360_s24 = smov 64   ;;  %s361_s25 = smov 4  }
 0x1df   :  { %250 = dma.vmem_to_hbm [thread:$0]  %s245_s16, 128, %s448_s5, [#allocation3], %s360_s24, %s360_s24, %s361_s25  }
 0x1e0   :  { %355 = dma.done.wait [#allocation3], 128  }
 0x1e1   :  { %356 = vsyncadd [#allocation3], 4294967168 }
 0x1e2   :  { %254 = vsyncpa [#allocation3], 1 }

</bundles_post_ra>
